<compile_context>
chip_gen: v7x
topology: tpu7x:2x2x1
jax: 0.10.0
libtpu: 0.0.40
codegen_flags: <defaults>
</compile_context>

<pallas_src>
import functools

import jax
import jax.numpy as jnp
from jax.experimental import pallas as pl
from jax.experimental.pallas import tpu as pltpu

_LANES = 512  # lane-dense layout width (multiple of 128)


def _round_up(x, m):
    return (x + m - 1) // m * m


def _accumulate(d_mag, d_ri, mag_ref, ri_ref, row_tile):
    """Fold (row_tile, L) contributions along rows into resident (8, L) accs."""
    lanes = d_mag.shape[-1]
    mag_ref[0] += jnp.sum(d_mag.reshape(row_tile // 8, 8, lanes), axis=0)
    ri_ref[0] += jnp.sum(d_ri.reshape(row_tile // 8, 8, lanes), axis=0)


def _spectral_loss_kernel(er_ref, ei_ref, cr_ref, ci_ref, mag_ref, ri_ref, *,
                          rows, row_tile, blocks_per_chunk, num_blocks,
                          need_mask):
    """Accumulates sum|d_mag| and sum(|d_re| + |d_im|) partial sums.

    er/ei/cr/ci_ref: (row_tile, L) f32 planar blocks.
    mag_ref/ri_ref:  (1, 8, L) f32 partial-sum blocks, resident across steps.
    """
    chunk = pl.program_id(0)
    step = pl.program_id(1)

    @pl.when(step == 0)
    def _init():
        mag_ref[...] = jnp.zeros_like(mag_ref)
        ri_ref[...] = jnp.zeros_like(ri_ref)

    er = er_ref[...]
    ei = ei_ref[...]
    cr = cr_ref[...]
    ci = ci_ref[...]

    # Note: magnitude via sqrt(re^2 + im^2) in f32 (not overflow-safe hypot);
    # fine for spectrogram-range values, documented deviation from torch.abs.
    mag_e = jnp.sqrt(er * er + ei * ei)
    mag_c = jnp.sqrt(cr * cr + ci * ci)
    d_mag = jnp.abs(mag_e - mag_c)
    d_ri = jnp.abs(er - cr) + jnp.abs(ei - ci)

    block = chunk * blocks_per_chunk + step

    if need_mask:
        # Only the last real block and phantom steps pay for the mask.
        @pl.when(block < num_blocks - 1)
        def _full_block():
            _accumulate(d_mag, d_ri, mag_ref, ri_ref, row_tile)

        @pl.when(block >= num_blocks - 1)
        def _tail_block():
            local_row = jax.lax.broadcasted_iota(jnp.int32, (row_tile, 1), 0)
            keep = (block * row_tile + local_row) < rows
            _accumulate(jnp.where(keep, d_mag, 0.0),
                        jnp.where(keep, d_ri, 0.0),
                        mag_ref, ri_ref, row_tile)
    else:
        _accumulate(d_mag, d_ri, mag_ref, ri_ref, row_tile)


def _planarize(x, rows, lanes, pad):
    """complex (or real) array -> lane-dense f32 (rows, lanes) real/imag planes."""
    r = jnp.real(x).astype(jnp.float32).reshape(-1)
    i = jnp.imag(x).astype(jnp.float32).reshape(-1)
    if pad:
        r = jnp.pad(r, (0, pad))   # zeros contribute 0 to every loss term
        i = jnp.pad(i, (0, pad))
    return r.reshape(rows, lanes), i.reshape(rows, lanes)


@functools.partial(jax.jit, static_argnums=(3, 4))
def _combined_spectral_loss_impl(est_spec, clean_spec, alpha, block_bytes,
                                 num_chunks):
    assert est_spec.shape == clean_spec.shape, "spectrogram shapes must match"
    n = est_spec.size                       # number of complex elements
    lanes = _LANES

    padded = _round_up(max(n, 1), 8 * lanes)
    pad = padded - n
    rows = padded // lanes                  # multiple of 8 by construction

    er, ei = _planarize(est_spec, rows, lanes, pad)
    cr, ci = _planarize(clean_spec, rows, lanes, pad)

    # Budget-driven row tile: ~block_bytes per planar input block.
    budget_rows = max(8, (block_bytes // (lanes * 4)) // 8 * 8)
    row_tile = min(budget_rows, rows)       # both multiples of 8
    num_blocks = pl.cdiv(rows, row_tile)
    num_chunks = max(1, min(num_chunks, num_blocks))
    blocks_per_chunk = pl.cdiv(num_blocks, num_chunks)
    # Any over-coverage (partial tail block or phantom steps) must be masked.
    need_mask = (num_chunks * blocks_per_chunk * row_tile) != rows

    def in_index_map(chunk, step):
        block = chunk * blocks_per_chunk + step
        # Clamp phantom steps onto the last real block; their contribution is
        # zeroed by the in-kernel mask.
        return (jnp.minimum(block, num_blocks - 1), 0)

    in_spec = pl.BlockSpec((row_tile, lanes), in_index_map)
    out_spec = pl.BlockSpec((1, 8, lanes), lambda chunk, step: (chunk, 0, 0))

    # VMEM budget: 4 planar inputs x 2 pipeline buffers x block + 2 resident
    # output blocks + headroom; capped at 28 MiB so it fits every generation
    # (v7x: 32 MiB scoped default / 64 MiB physical per TC).
    in_block_bytes = row_tile * lanes * 4
    out_bytes = 2 * 2 * 8 * lanes * 4
    vmem_limit = int(min(28 << 20,
                         max(8 << 20, 8 * in_block_bytes + out_bytes + (2 << 20))))

    kernel = functools.partial(
        _spectral_loss_kernel, rows=rows, row_tile=row_tile,
        blocks_per_chunk=blocks_per_chunk, num_blocks=num_blocks,
        need_mask=need_mask)

    mag_parts, ri_parts = pl.pallas_call(
        kernel,
        out_shape=(jax.ShapeDtypeStruct((num_chunks, 8, lanes), jnp.float32),
                   jax.ShapeDtypeStruct((num_chunks, 8, lanes), jnp.float32)),
        grid_spec=pltpu.PrefetchScalarGridSpec(
            num_scalar_prefetch=0,
            grid=(num_chunks, blocks_per_chunk),
            in_specs=[in_spec, in_spec, in_spec, in_spec],
            out_specs=[out_spec, out_spec],
        ),
        compiler_params=pltpu.CompilerParams(
            dimension_semantics=("parallel", "arbitrary"),
            vmem_limit_bytes=vmem_limit,
            # Let XLA fuse the real/imag/reshape/pad producers into the call
            # so the planar planes are never round-tripped through HBM.
            allow_input_fusion=[True, True, True, True],
        ),
    )(er, ei, cr, ci)

    # Tiny epilogue in plain JAX: cross-lane reduce, alpha weighting, 1/n, clamp.
    inv_n = 1.0 / jnp.float32(n)
    l_mag = jnp.sum(mag_parts) * inv_n
    l_ri = jnp.sum(ri_parts) * inv_n
    loss = alpha * l_mag + (1.0 - alpha) * l_ri
    return jnp.maximum(loss, jnp.float32(1e-6))


def _default_num_chunks():
    # v7x has two TensorCores per chip sharing HBM: chunk the reduction so
    # each core streams a disjoint row range.  Single-TC v5e/v6e: one chunk.
    try:
        kind = jax.devices()[0].device_kind.lower()
    except Exception:
        return 1
    return 2 if "v7" in kind else 1


def combined_spectral_loss(est_spec, clean_spec, alpha=0.5,
                           block_bytes=2 << 20, num_chunks=None):
    """Pallas TPU implementation of CombinedSpectralLoss.forward.

    est_spec / clean_spec: complex arrays of identical shape.  Returns a
    float32 scalar:
        max(alpha * L1(|est|, |clean|)
            + (1 - alpha) * (L1(Re est, Re clean) + L1(Im est, Im clean)), 1e-6)
    """
    if num_chunks is None:
        num_chunks = _default_num_chunks()
    return _combined_spectral_loss_impl(est_spec, clean_spec, float(alpha),
                                        int(block_bytes), int(num_chunks))


def _reference_loss(est_spec, clean_spec, alpha=0.5):
    l_mag = jnp.mean(jnp.abs(jnp.abs(est_spec) - jnp.abs(clean_spec)))
    l_ri = (jnp.mean(jnp.abs(jnp.real(est_spec) - jnp.real(clean_spec)))
            + jnp.mean(jnp.abs(jnp.imag(est_spec) - jnp.imag(clean_spec))))
    loss = alpha * l_mag + (1.0 - alpha) * l_ri
    return jnp.maximum(loss, 1e-6)


def _make_complex(key, shape):
    kr, ki = jax.random.split(key)
    return (jax.random.normal(kr, shape, jnp.float32)
            + 1j * jax.random.normal(ki, shape, jnp.float32)).astype(jnp.complex64)


if __name__ == "__main__":
    key = jax.random.PRNGKey(0)
    k1, k2, k3, k4 = jax.random.split(key, 4)

    # Main case: (B, F, T) complex spectrograms; small problem -> single-block grid.
    B, F, T = 2, 64, 128
    est = _make_complex(k1, (B, F, T))
    clean = _make_complex(k2, (B, F, T))
    loss = jax.block_until_ready(combined_spectral_loss(est, clean, alpha=0.5))
    ref = _reference_loss(est, clean, alpha=0.5)
    assert jnp.allclose(loss, ref, rtol=1e-5, atol=1e-5), (loss, ref)

    # Ragged case: T=100 (not a multiple of 128) exercises the lane-dense
    # flatten + zero pad; a tiny block budget + num_chunks=2 exercises the
    # multi-block reduction, the gated tail mask and phantom-step clamping.
    est2 = _make_complex(k3, (3, 37, 100))
    clean2 = _make_complex(k4, (3, 37, 100))
    loss2 = jax.block_until_ready(
        combined_spectral_loss(est2, clean2, alpha=0.3,
                               block_bytes=8 * _LANES * 4, num_chunks=2))
    ref2 = _reference_loss(est2, clean2, alpha=0.3)
    assert jnp.allclose(loss2, ref2, rtol=1e-5, atol=1e-5), (loss2, ref2)

    print("KERNEL_OK")
</pallas_src>

<mosaic_0001>
module attributes {stable_mosaic.version = 11 : i64} {
  func.func @_spectral_loss_kernel(%arg0: i32, %arg1: i32, %arg2: memref<32x512xf32, #tpu.memory_space<vmem>>, %arg3: memref<32x512xf32, #tpu.memory_space<vmem>>, %arg4: memref<32x512xf32, #tpu.memory_space<vmem>>, %arg5: memref<32x512xf32, #tpu.memory_space<vmem>>, %arg6: memref<1x8x512xf32, #tpu.memory_space<vmem>>, %arg7: memref<1x8x512xf32, #tpu.memory_space<vmem>>) attributes {dimension_semantics = [#tpu.dimension_semantics<parallel>, #tpu.dimension_semantics<arbitrary>], iteration_bounds = array<i64: 1, 1>, scalar_prefetch = 0 : i64, scratch_operands = 0 : i64, tpu.core_type = #tpu.core_type<tc>, window_params = [{transform_indices = @transform_0, window_bounds = array<i64: 32, 512>}, {transform_indices = @transform_1, window_bounds = array<i64: 32, 512>}, {transform_indices = @transform_2, window_bounds = array<i64: 32, 512>}, {transform_indices = @transform_3, window_bounds = array<i64: 32, 512>}, {transform_indices = @transform_4, window_bounds = array<i64: 1, 8, 512>}, {transform_indices = @transform_5, window_bounds = array<i64: 1, 8, 512>}]} {
    %c0_i32 = arith.constant 0 : i32
    %0 = arith.cmpi eq, %arg1, %c0_i32 : i32
    %1 = arith.extui %0 : i1 to i32
    %c0_i32_0 = arith.constant 0 : i32
    %2 = arith.cmpi ne, %1, %c0_i32_0 : i32
    scf.if %2 {
      %cst_21 = arith.constant 0.000000e+00 : f32
      %38 = vector.broadcast %cst_21 : f32 to vector<1x8x512xf32>
      %c0_22 = arith.constant 0 : index
      %c0_23 = arith.constant 0 : index
      %c0_24 = arith.constant 0 : index
      %39 = vector.load %arg6[%c0_22, %c0_23, %c0_24] : memref<1x8x512xf32, #tpu.memory_space<vmem>>, vector<1x8x512xf32>
      tpu.vector_store %arg6[%c0_22, %c0_23, %c0_24], %38 {strides = array<i32>} : memref<1x8x512xf32, #tpu.memory_space<vmem>>, vector<1x8x512xf32>,
      %cst_25 = arith.constant 0.000000e+00 : f32
      %40 = vector.broadcast %cst_25 : f32 to vector<1x8x512xf32>
      %c0_26 = arith.constant 0 : index
      %c0_27 = arith.constant 0 : index
      %c0_28 = arith.constant 0 : index
      %41 = vector.load %arg7[%c0_26, %c0_27, %c0_28] : memref<1x8x512xf32, #tpu.memory_space<vmem>>, vector<1x8x512xf32>
      tpu.vector_store %arg7[%c0_26, %c0_27, %c0_28], %40 {strides = array<i32>} : memref<1x8x512xf32, #tpu.memory_space<vmem>>, vector<1x8x512xf32>,
    } else {
    }
    %c0 = arith.constant 0 : index
    %c0_1 = arith.constant 0 : index
    %3 = vector.load %arg2[%c0, %c0_1] : memref<32x512xf32, #tpu.memory_space<vmem>>, vector<32x512xf32>
    %c0_2 = arith.constant 0 : index
    %c0_3 = arith.constant 0 : index
    %4 = vector.load %arg3[%c0_2, %c0_3] : memref<32x512xf32, #tpu.memory_space<vmem>>, vector<32x512xf32>
    %c0_4 = arith.constant 0 : index
    %c0_5 = arith.constant 0 : index
    %5 = vector.load %arg4[%c0_4, %c0_5] : memref<32x512xf32, #tpu.memory_space<vmem>>, vector<32x512xf32>
    %c0_6 = arith.constant 0 : index
    %c0_7 = arith.constant 0 : index
    %6 = vector.load %arg5[%c0_6, %c0_7] : memref<32x512xf32, #tpu.memory_space<vmem>>, vector<32x512xf32>
    %7 = arith.mulf %3, %3 : vector<32x512xf32>
    %8 = arith.mulf %4, %4 : vector<32x512xf32>
    %9 = arith.addf %7, %8 : vector<32x512xf32>
    %10 = math.sqrt %9 : vector<32x512xf32>
    %11 = arith.mulf %5, %5 : vector<32x512xf32>
    %12 = arith.mulf %6, %6 : vector<32x512xf32>
    %13 = arith.addf %11, %12 : vector<32x512xf32>
    %14 = math.sqrt %13 : vector<32x512xf32>
    %15 = arith.subf %10, %14 : vector<32x512xf32>
    %16 = math.absf %15 : vector<32x512xf32>
    %17 = arith.subf %3, %5 : vector<32x512xf32>
    %18 = math.absf %17 : vector<32x512xf32>
    %19 = arith.subf %4, %6 : vector<32x512xf32>
    %20 = math.absf %19 : vector<32x512xf32>
    %21 = arith.addf %18, %20 : vector<32x512xf32>
    %c0_8 = arith.constant 0 : index
    %c0_9 = arith.constant 0 : index
    %c0_10 = arith.constant 0 : index
    %22 = vector.load %arg6[%c0_8, %c0_9, %c0_10] : memref<1x8x512xf32, #tpu.memory_space<vmem>>, vector<1x8x512xf32>
    %23 = vector.shape_cast %22 : vector<1x8x512xf32> to vector<8x512xf32>
    %24 = vector.shape_cast %16 : vector<32x512xf32> to vector<4x8x512xf32>
    %cst = arith.constant dense<0.000000e+00> : vector<8x512xf32>
    %25 = vector.multi_reduction <add>, %24, %cst [0] : vector<4x8x512xf32> to vector<8x512xf32>
    %26 = arith.addf %23, %25 : vector<8x512xf32>
    %c0_11 = arith.constant 0 : index
    %c0_12 = arith.constant 0 : index
    %c0_13 = arith.constant 0 : index
    %27 = vector.load %arg6[%c0_11, %c0_12, %c0_13] : memref<1x8x512xf32, #tpu.memory_space<vmem>>, vector<1x8x512xf32>
    %28 = vector.shape_cast %27 : vector<1x8x512xf32> to vector<8x512xf32>
    %29 = vector.shape_cast %26 : vector<8x512xf32> to vector<1x8x512xf32>
    tpu.vector_store %arg6[%c0_11, %c0_12, %c0_13], %29 {strides = array<i32>} : memref<1x8x512xf32, #tpu.memory_space<vmem>>, vector<1x8x512xf32>,
    %c0_14 = arith.constant 0 : index
    %c0_15 = arith.constant 0 : index
    %c0_16 = arith.constant 0 : index
    %30 = vector.load %arg7[%c0_14, %c0_15, %c0_16] : memref<1x8x512xf32, #tpu.memory_space<vmem>>, vector<1x8x512xf32>
    %31 = vector.shape_cast %30 : vector<1x8x512xf32> to vector<8x512xf32>
    %32 = vector.shape_cast %21 : vector<32x512xf32> to vector<4x8x512xf32>
    %cst_17 = arith.constant dense<0.000000e+00> : vector<8x512xf32>
    %33 = vector.multi_reduction <add>, %32, %cst_17 [0] : vector<4x8x512xf32> to vector<8x512xf32>
    %34 = arith.addf %31, %33 : vector<8x512xf32>
    %c0_18 = arith.constant 0 : index
    %c0_19 = arith.constant 0 : index
    %c0_20 = arith.constant 0 : index
    %35 = vector.load %arg7[%c0_18, %c0_19, %c0_20] : memref<1x8x512xf32, #tpu.memory_space<vmem>>, vector<1x8x512xf32>
    %36 = vector.shape_cast %35 : vector<1x8x512xf32> to vector<8x512xf32>
    %37 = vector.shape_cast %34 : vector<8x512xf32> to vector<1x8x512xf32>
    tpu.vector_store %arg7[%c0_18, %c0_19, %c0_20], %37 {strides = array<i32>} : memref<1x8x512xf32, #tpu.memory_space<vmem>>, vector<1x8x512xf32>,
    return
  }
  func.func @transform_0(%arg0: i32, %arg1: i32) -> (i32, i32) {
    %c1_i32 = arith.constant 1 : i32
    %0 = arith.muli %arg0, %c1_i32 : i32
    %1 = arith.addi %0, %arg1 : i32
    %c0_i32 = arith.constant 0 : i32
    %2 = arith.minsi %1, %c0_i32 : i32
    %c0_i32_0 = arith.constant 0 : i32
    %c0_i32_1 = arith.constant 0 : i32
    return %2, %c0_i32_0 : i32, i32
  }
  func.func @transform_1(%arg0: i32, %arg1: i32) -> (i32, i32) {
    %c1_i32 = arith.constant 1 : i32
    %0 = arith.muli %arg0, %c1_i32 : i32
    %1 = arith.addi %0, %arg1 : i32
    %c0_i32 = arith.constant 0 : i32
    %2 = arith.minsi %1, %c0_i32 : i32
    %c0_i32_0 = arith.constant 0 : i32
    %c0_i32_1 = arith.constant 0 : i32
    return %2, %c0_i32_0 : i32, i32
  }
  func.func @transform_2(%arg0: i32, %arg1: i32) -> (i32, i32) {
    %c1_i32 = arith.constant 1 : i32
    %0 = arith.muli %arg0, %c1_i32 : i32
    %1 = arith.addi %0, %arg1 : i32
    %c0_i32 = arith.constant 0 : i32
    %2 = arith.minsi %1, %c0_i32 : i32
    %c0_i32_0 = arith.constant 0 : i32
    %c0_i32_1 = arith.constant 0 : i32
    return %2, %c0_i32_0 : i32, i32
  }
  func.func @transform_3(%arg0: i32, %arg1: i32) -> (i32, i32) {
    %c1_i32 = arith.constant 1 : i32
    %0 = arith.muli %arg0, %c1_i32 : i32
    %1 = arith.addi %0, %arg1 : i32
    %c0_i32 = arith.constant 0 : i32
    %2 = arith.minsi %1, %c0_i32 : i32
    %c0_i32_0 = arith.constant 0 : i32
    %c0_i32_1 = arith.constant 0 : i32
    return %2, %c0_i32_0 : i32, i32
  }
  func.func @transform_4(%arg0: i32, %arg1: i32) -> (i32, i32, i32) {
    %c0_i32 = arith.constant 0 : i32
    %c0_i32_0 = arith.constant 0 : i32
    %c0_i32_1 = arith.constant 0 : i32
    return %arg0, %c0_i32, %c0_i32_0 : i32, i32, i32
  }
  func.func @transform_5(%arg0: i32, %arg1: i32) -> (i32, i32, i32) {
    %c0_i32 = arith.constant 0 : i32
    %c0_i32_0 = arith.constant 0 : i32
    %c0_i32_1 = arith.constant 0 : i32
    return %arg0, %c0_i32, %c0_i32_0 : i32, i32, i32
  }
}

</mosaic_0001>

<bundles_post_ra>
// kernel: custom-call.1
= control target key start
LH: loop header
LB: loop body
LE: loop exit
PB: predicated region body
PF: predicated region fallthrough
CT: control target
= control target key end

     0   :  { %s59_s0 = inlined_call_operand.hbm [shape: c64[2,64,128], index: 0, kind: input, shape index: {}]   ;;  %s60_s1 = inlined_call_operand.vmem [shape: f32[2,64,128], index: 1, kind: output, shape index: {}]  }
   0x1   :  { %s2_s8 = scalar_lea.hbm %s59_s0, 2048 }
   0x2   :  { %3 = vsyncpa [#allocation0], 0  ;;  %s4_s11 = sshll.u32 %s60_s1, 4  ;;  %s34_s14 = scalar_lea.hbm %s59_s0, 4096  ;;  %s5_s11 = int_to_ptr.vmem [resolvable:$true] %s4_s11 }
   0x3   :  { %p11_p0 = scmp.ne.s32.totalorder %s2_s8, %s34_s14  ;;  %p13_p1 = scmp.lt.u32.totalorder %s2_s8, %s59_s0 }
   0x4   :  { %p14_p2 = scmp.lt.u32.totalorder %s34_s14, %s34_s14  ;;  %p16_p4 = scmp.lt.u32.totalorder %s34_s14, %s2_s8 }
   0x6   :  { %p15_p3 = por %p14_p2, %p13_p1 }
   0x8   :  { %p17_p5 = por %p16_p4, %p15_p3 }
   0xa   :  { %p18_p6 = pnand %p17_p5, %p11_p0 }
   0xc   :  { %21 = shalt.err (!%p18_p6)  }
   0xd   :  { %s22_s17 = scalar_lea.vmem %s5_s11, 2048  ;;  %p27_p8 = scmp.lt.s32.totalorder %s5_s11, %s5_s11 }
   0xe   :  { %p23_p7 = scmp.ne.s32.totalorder %s5_s11, %s22_s17  ;;  %p28_p9 = scmp.lt.s32.totalorder %s22_s17, %s22_s17 }
  0x10   :  { %p29_p10 = por %p28_p9, %p27_p8 }
  0x12   :  { %p30_p11 = pnand %p29_p10, %p23_p7 }
  0x14   :  { %33 = shalt.err (!%p30_p11)  }
  0x15   :  { %7 = dma.hbm_to_vmem [thread:$0]  %s2_s8, 2048, %s5_s11, [#allocation0] }
  0x16   :  { %35 = dma.done.wait [#allocation0], 2048  }
  0x17   :  { %36 = vsyncadd [#allocation0], 4294965248 }
  0x18   :  { %9 = vsyncpa [#allocation0], 1 }

// kernel: custom-call
= control target key start
LH: loop header
LB: loop body
LE: loop exit
PB: predicated region body
PF: predicated region fallthrough
CT: control target
= control target key end

     0   :  { %2 = vsyncpa [#allocation0], 0  ;;  %s61_s0 = inlined_call_operand.hbm [shape: c64[2,64,128], index: 0, kind: input, shape index: {}]   ;;  %s62_s1 = inlined_call_operand.vmem [shape: f32[2,64,128], index: 1, kind: output, shape index: {}]  }
   0x1   :  { %s3_s8 = sshll.u32 %s62_s1, 4  ;;  %s9_s11 = scalar_lea.hbm %s61_s0, 2048  ;;  %s4_s8 = int_to_ptr.vmem [resolvable:$true] %s3_s8 }
   0x2   :  { %p10_p0 = scmp.ne.s32.totalorder %s61_s0, %s9_s11  ;;  %s11_s16 = scalar_lea.hbm %s61_s0, 4096 }
   0x3   :  { %p12_p1 = scmp.lt.u32.totalorder %s11_s16, %s9_s11  ;;  %p13_p2 = scmp.lt.u32.totalorder %s9_s11, %s61_s0 }
   0x5   :  { %p14_p3 = por %p13_p2, %p12_p1 }
   0x7   :  { %p15_p4 = pnand %p14_p3, %p10_p0 }
   0x9   :  { %18 = shalt.err (!%p15_p4)  }
   0xa   :  { %s19_s1 = scalar_lea.vmem %s4_s8, 2048  ;;  %p24_p6 = scmp.lt.s32.totalorder %s4_s8, %s4_s8 }
   0xb   :  { %p20_p5 = scmp.ne.s32.totalorder %s4_s8, %s19_s1  ;;  %p25_p7 = scmp.lt.s32.totalorder %s19_s1, %s19_s1 }
   0xd   :  { %p26_p8 = por %p25_p7, %p24_p6 }
   0xf   :  { %p27_p9 = pnand %p26_p8, %p20_p5 }
  0x11   :  { %30 = shalt.err (!%p27_p9)  }
  0x12   :  { %6 = dma.hbm_to_vmem [thread:$0]  %s61_s0, 2048, %s4_s8, [#allocation0] }
  0x13   :  { %31 = dma.done.wait [#allocation0], 2048  }
  0x14   :  { %32 = vsyncadd [#allocation0], 4294965248 }
  0x15   :  { %8 = vsyncpa [#allocation0], 1 }

// kernel: _combined_spectral_loss_impl.1
= control target key start
LH: loop header
LB: loop body
LE: loop exit
PB: predicated region body
PF: predicated region fallthrough
CT: control target
= control target key end

     0   :  { %s1797_s0 = inlined_call_operand.vmem [shape: f32[32,512], index: 0, kind: input, shape index: {}]   ;;  %s1798_s1 = inlined_call_operand.vmem [shape: f32[32,512], index: 1, kind: input, shape index: {}]   ;;  %s1799_s2 = inlined_call_operand.vmem [shape: f32[32,512], index: 2, kind: input, shape index: {}]   ;;  %s1800_s3 = inlined_call_operand.vmem [shape: f32[32,512], index: 3, kind: input, shape index: {}]   ;;  %s1801_s4 = inlined_call_operand.vmem [shape: f32[1,8,512], index: 4, kind: output, shape index: {0}]   ;;  %s1802_s5 = inlined_call_operand.vmem [shape: f32[1,8,512], index: 5, kind: output, shape index: {1}]  }
   0x1   :  { %v845_v0 = vld [vmem:[%s1797_s0] sm:$0xff]  ;;  %v976_v39 = vld [vmem:[%s1797_s0 + $0x8] sm:$0xff]  ;;  %v1305_v17 = vld [vmem:[%s1799_s2 + $0x10] sm:$0xff] }
   0x2   :  { %v850_v1 = vld [vmem:[%s1797_s0 + $0x20] sm:$0xff]  ;;  %v235_v6 = vmul.f32 %v845_v0, %v845_v0  ;;  %v981_v40 = vld [vmem:[%s1798_s1 + $0x8] sm:$0xff]  ;;  %v236_v52 = vmul.f32 %v976_v39, %v976_v39  ;;  %1843 = vst [vmem:[#allocation11_spill] sm:$0xff] %v1305_v17 }
   0x3   :  { %v855_v2 = vld [vmem:[%s1797_s0 + $0x40] sm:$0xff]  ;;  %v239_v7 = vmul.f32 %v850_v1, %v850_v1  ;;  %v993_v44 = vld [vmem:[%s1797_s0 + $0x28] sm:$0xff]  ;;  %v252_v53 = vmul.f32 %v981_v40, %v981_v40 }
   0x4   :  { %v860_v3 = vld [vmem:[%s1797_s0 + $0x60] sm:$0xff]  ;;  %v243_v8 = vmul.f32 %v855_v2, %v855_v2  ;;  %v998_v45 = vld [vmem:[%s1797_s0 + $0x48] sm:$0xff]  ;;  %v240_v55 = vmul.f32 %v993_v44, %v993_v44 }
   0x5   :  { %v865_v4 = vld [vmem:[%s1798_s1] sm:$0xff]  ;;  %v247_v12 = vmul.f32 %v860_v3, %v860_v3  ;;  %v1003_v46 = vld [vmem:[%s1797_s0 + $0x68] sm:$0xff]  ;;  %v244_v56 = vmul.f32 %v998_v45, %v998_v45 }
   0x6   :  { %v870_v5 = vld [vmem:[%s1798_s1 + $0x20] sm:$0xff]  ;;  %v251_v13 = vmul.f32 %v865_v4, %v865_v4  ;;  %v1017_v50 = vld [vmem:[%s1798_s1 + $0x28] sm:$0xff]  ;;  %v248_v57 = vmul.f32 %v1003_v46, %v1003_v46 }
   0x7   :  { %v881_v9 = vld [vmem:[%s1798_s1 + $0x40] sm:$0xff]  ;;  %v255_v14 = vmul.f32 %v870_v5, %v870_v5  ;;  %v1022_v51 = vld [vmem:[%s1798_s1 + $0x48] sm:$0xff]  ;;  %v256_v62 = vmul.f32 %v1017_v50, %v1017_v50 }
   0x8   :  { %v886_v10 = vld [vmem:[%s1798_s1 + $0x60] sm:$0xff]  ;;  %v259_v15 = vmul.f32 %v881_v9, %v881_v9  ;;  %v910_v19 = vadd.f32 %v251_v13, %v235_v6  ;;  %v1032_v54 = vld [vmem:[%s1798_s1 + $0x68] sm:$0xff]  ;;  %v260_v63 = vmul.f32 %v1022_v51, %v1022_v51 }
   0x9   :  { %v891_v11 = vld [vmem:[%s1799_s2] sm:$0xff]  ;;  %v263_v16 = vmul.f32 %v886_v10, %v886_v10  ;;  %v912_v20 = vadd.f32 %v255_v14, %v239_v7  ;;  %1834 = vst [vmem:[#allocation2_spill] sm:$0xff] %v1032_v54 }
   0xa   :  { %v908_v18 = vld [vmem:[%s1800_s3] sm:$0xff]  ;;  %v929_v24 = vadd.f32 %v259_v15, %v243_v8  ;;  %748 = vrsqrt.f32 %v910_v19  ;;  %v395_v26 = vmul.f32 %v891_v11, %v891_v11  ;;  %vm285_vm0 = vcmp.eq.f32.partialorder %v910_v19, inf }
   0xb   :  { %v917_v21 = vld [vmem:[%s1799_s2 + $0x20] sm:$0xff]  ;;  %v931_v25 = vadd.f32 %v263_v16, %v247_v12  ;;  %v411_v27 = vmul.f32 %v908_v18, %v908_v18  ;;  %750 = vrsqrt.f32 %v912_v20  ;;  %v288_v38 = vand.u32 2147483648, %v910_v19 }
   0xc   :  { %v922_v22 = vld [vmem:[%s1799_s2 + $0x40] sm:$0xff]  ;;  %752 = vrsqrt.f32 %v929_v24  ;;  %v399_v31 = vmul.f32 %v917_v21, %v917_v21  ;;  %vm313_vm1 = vcmp.eq.f32.partialorder %v912_v20, inf  ;;  %vm287_vm2 = vcmp.eq.f32.partialorder %v910_v19, 0.0 }
   0xd   :  { %v927_v23 = vld [vmem:[%s1799_s2 + $0x60] sm:$0xff]  ;;  %v403_v32 = vmul.f32 %v922_v22, %v922_v22  ;;  %754 = vrsqrt.f32 %v931_v25  ;;  %v968_v37 = vadd.f32 %v411_v27, %v395_v26  ;;  %vm315_vm3 = vcmp.eq.f32.partialorder %v912_v20, 0.0 }
   0xe   :  { %v941_v28 = vld [vmem:[%s1800_s3 + $0x20] sm:$0xff]  ;;  %v407_v33 = vmul.f32 %v927_v23, %v927_v23  ;;  %v316_v47 = vand.u32 2147483648, %v912_v20  ;;  %vm341_vm4 = vcmp.eq.f32.partialorder %v929_v24, inf  ;;  %v344_v48 = vand.u32 2147483648, %v929_v24 }
   0xf   :  { %v946_v29 = vld [vmem:[%s1800_s3 + $0x40] sm:$0xff]  ;;  %v415_v34 = vmul.f32 %v941_v28, %v941_v28  ;;  %756 = vrsqrt.f32 %v968_v37  ;;  %vm369_vm5 = vcmp.eq.f32.partialorder %v931_v25, inf  ;;  %vm343_vm6 = vcmp.eq.f32.partialorder %v929_v24, 0.0 }
  0x10   :  { %v951_v30 = vld [vmem:[%s1800_s3 + $0x60] sm:$0xff]  ;;  %v419_v35 = vmul.f32 %v946_v29, %v946_v29  ;;  %v372_v49 = vand.u32 2147483648, %v931_v25  ;;  %vm371_vm7 = vcmp.eq.f32.partialorder %v931_v25, 0.0  ;;  %vm445_vm8 = vcmp.eq.f32.partialorder %v968_v37, inf }
  0x11   :  { %v423_v36 = vmul.f32 %v951_v30, %v951_v30  ;;  %v983_v41 = vadd.f32 %v415_v34, %v399_v31  ;;  %vm447_vm9 = vcmp.eq.f32.partialorder %v968_v37, 0.0  ;;  %v448_v59 = vand.u32 2147483648, %v968_v37  ;;  %v1068_v31 = vld [vmem:[%s1799_s2 + $0x8] sm:$0xff] }
  0x12   :  { %v985_v42 = vadd.f32 %v419_v35, %v403_v32  ;;  %v264_v8 = vmul.f32 %v1032_v54, %v1032_v54  ;;  %v1055_v12 = vadd.f32 %v252_v53, %v236_v52  ;;  %v1060_v16 = vadd.f32 %v256_v62, %v240_v55  ;;  %v1073_v32 = vld [vmem:[%s1799_s2 + $0x28] sm:$0xff] }
  0x13   :  { %v987_v43 = vadd.f32 %v423_v36, %v407_v33  ;;  %758 = vrsqrt.f32 %v983_v41  ;;  %vm473_vm10 = vcmp.eq.f32.partialorder %v983_v41, inf  ;;  %vm475_vm11 = vcmp.eq.f32.partialorder %v983_v41, 0.0 }
  0x14   :  { %760 = vrsqrt.f32 %v985_v42  ;;  %v749_v58 = vpop.eup %748  ;;  %v476_v15 = vand.u32 2147483648, %v983_v41  ;;  %vm501_vm12 = vcmp.eq.f32.partialorder %v985_v42, inf  ;;  %vm503_vm13 = vcmp.eq.f32.partialorder %v985_v42, 0.0 }
  0x15   :  { %762 = vrsqrt.f32 %v987_v43  ;;  %v751_v60 = vpop.eup %750  ;;  %v284_v61 = vmul.f32 %v749_v58, %v910_v19  ;;  %v504_v27 = vand.u32 2147483648, %v985_v42  ;;  %v1075_v33 = vadd.f32 %v260_v63, %v244_v56 }
  0x16   :  { %v753_v6 = vpop.eup %752  ;;  %v312_v7 = vmul.f32 %v751_v60, %v912_v20  ;;  %vm529_vm14 = vcmp.eq.f32.partialorder %v987_v43, inf  ;;  %764 = vrsqrt.f32 %v1055_v12  ;;  %vm531_vm15 = vcmp.eq.f32.partialorder %v987_v43, 0.0 }
  0x17   :  { %v755_v13 = vpop.eup %754  ;;  %v340_v14 = vmul.f32 %v753_v6, %v929_v24  ;;  %v286_v34 = vsel %vm285_vm0, %v910_v19, %v284_v61  ;;  %v532_v53 = vand.u32 2147483648, %v987_v43  ;;  %v1090_v55 = vadd.f32 %v264_v8, %v248_v57 }
  0x18   :  { %v368_v26 = vmul.f32 %v755_v13, %v931_v25  ;;  %v314_v35 = vsel %vm313_vm1, %v912_v20, %v312_v7  ;;  %766 = vrsqrt.f32 %v1060_v16  ;;  %v396_v58 = vmul.f32 %v1068_v31, %v1068_v31  ;;  %v1117_v20 = vld [vmem:[%s1799_s2 + $0x48] sm:$0xff] }
  0x19   :  { %v757_v36 = vpop.eup %756  ;;  %v342_v52 = vsel %vm341_vm4, %v929_v24, %v340_v14  ;;  %v400_v60 = vmul.f32 %v1073_v32, %v1073_v32  ;;  %v289_v62 = vsel %vm287_vm2, %v288_v38, %v286_v34  ;;  %v317_v57 = vsel %vm315_vm3, %v316_v47, %v314_v35  ;;  %v1152_v35 = vld [vmem:[%s1800_s3 + $0x28] sm:$0xff] }
  0x1a   :  { %v444_v56 = vmul.f32 %v757_v36, %v968_v37  ;;  %v370_v63 = vsel %vm369_vm5, %v931_v25, %v368_v26  ;;  %768 = vrsqrt.f32 %v1075_v33  ;;  %v345_v7 = vsel %vm343_vm6, %v344_v48, %v342_v52  ;;  %v1157_v36 = vld [vmem:[%s1800_s3 + $0x48] sm:$0xff] }
  0x1b   :  { %vm292_vm0 = vcmp.eq.f32.partialorder %v1055_v12, inf  ;;  %v295_v48 = vand.u32 2147483648, %v1055_v12  ;;  %770 = vrsqrt.f32 %v1090_v55  ;;  %v373_v13 = vsel %vm371_vm7, %v372_v49, %v370_v63 }
  0x1c   :  { %v446_v8 = vsel %vm445_vm8, %v968_v37, %v444_v56  ;;  %v1136_v37 = vld [vmem:[%s1799_s2 + $0x68] sm:$0xff]  ;;  %vm294_vm1 = vcmp.eq.f32.partialorder %v1055_v12, 0.0  ;;  %vm320_vm2 = vcmp.eq.f32.partialorder %v1060_v16, inf  ;;  %vm322_vm3 = vcmp.eq.f32.partialorder %v1060_v16, 0.0 }
  0x1d   :  { %v759_v61 = vpop.eup %758  ;;  %v449_v47 = vsel %vm447_vm9, %v448_v59, %v446_v8  ;;  %v1141_v59 = vld [vmem:[%s1800_s3 + $0x8] sm:$0xff]  ;;  %vm348_vm4 = vcmp.eq.f32.partialorder %v1075_v33, inf  ;;  %vm350_vm5 = vcmp.eq.f32.partialorder %v1075_v33, 0.0  ;;  %vm376_vm6 = vcmp.eq.f32.partialorder %v1090_v55, inf }
  0x1e   :  { %v761_v6 = vpop.eup %760  ;;  %v472_v19 = vmul.f32 %v759_v61, %v983_v41  ;;  %v555_v34 = vsub.f32 %v289_v62, %v449_v47  ;;  %v1170_v62 = vld [vmem:[%s1800_s3 + $0x68] sm:$0xff]  ;;  %v420_v47 = vmul.f32 %v1157_v36, %v1157_v36  ;;  %vm378_vm7 = vcmp.eq.f32.partialorder %v1090_v55, 0.0 }
  0x1f   :  { %v763_v38 = vpop.eup %762  ;;  %v500_v24 = vmul.f32 %v761_v6, %v985_v42 }
  0x20   :  { %v474_v14 = vsel %vm473_vm10, %v983_v41, %v472_v19  ;;  %v528_v26 = vmul.f32 %v763_v38, %v987_v43  ;;  %v404_v41 = vmul.f32 %v1117_v20, %v1117_v20  ;;  %v571_v61 = vand.u32 2147483647, %v555_v34  ;;  %v765_v8 = vpop.eup %764 }
  0x21   :  { %v477_v25 = vsel %vm475_vm11, %v476_v15, %v474_v14  ;;  %v502_v49 = vsel %vm501_vm12, %v985_v42, %v500_v24  ;;  %v408_v42 = vmul.f32 %v1136_v37, %v1136_v37  ;;  %v416_v38 = vmul.f32 %v1152_v35, %v1152_v35 }
  0x22   :  { %v505_v15 = vsel %vm503_vm13, %v504_v27, %v502_v49  ;;  %v530_v52 = vsel %vm529_vm14, %v987_v43, %v528_v26  ;;  %v559_v56 = vsub.f32 %v317_v57, %v477_v25  ;;  %v412_v27 = vmul.f32 %v1141_v59, %v1141_v59  ;;  %v767_v14 = vpop.eup %766 }
  0x23   :  { %v533_v63 = vsel %vm531_vm15, %v532_v53, %v530_v52  ;;  %v563_v6 = vsub.f32 %v345_v7, %v505_v15  ;;  %v291_v43 = vmul.f32 %v765_v8, %v1055_v12  ;;  %v424_v53 = vmul.f32 %v1170_v62, %v1170_v62 }
  0x24   :  { %v567_v57 = vsub.f32 %v373_v13, %v533_v63  ;;  %v575_v19 = vand.u32 2147483647, %v559_v56  ;;  %v1186_v7 = vadd.f32 %v412_v27, %v396_v58  ;;  %v323_v13 = vand.u32 2147483648, %v1060_v16  ;;  %v769_v49 = vpop.eup %768 }
  0x25   :  { %v579_v24 = vand.u32 2147483647, %v563_v6  ;;  %v1189_v25 = vadd.f32 %v416_v38, %v400_v60  ;;  %v319_v15 = vmul.f32 %v767_v14, %v1060_v16  ;;  %v293_v58 = vsel %vm292_vm0, %v1055_v12, %v291_v43  ;;  %v771_v60 = vpop.eup %770  ;;  %v1221_v38 = vld [vmem:[%s1797_s0 + $0x10] sm:$0xff] }
  0x26   :  { %v583_v26 = vand.u32 2147483647, %v567_v57  ;;  %v671_v34 = vadd.f32 %v575_v19, %v571_v61  ;;  %772 = vrsqrt.f32 %v1186_v7  ;;  %v347_v56 = vmul.f32 %v769_v49, %v1075_v33  ;;  %1835 = vst [vmem:[#allocation3_spill] sm:$0xff] %v1221_v38  ;;  %v1244_v43 = vld [vmem:[%s1798_s1 + $0x10] sm:$0xff] }
  0x27   :  { %v1199_v61 = vadd.f32 %v420_v47, %v404_v41  ;;  %v351_v63 = vand.u32 2147483648, %v1075_v33  ;;  %v1203_v6 = vadd.f32 %v424_v53, %v408_v42  ;;  %774 = vrsqrt.f32 %v1189_v25  ;;  %v1226_v47 = vld [vmem:[%s1797_s0 + $0x30] sm:$0xff]  ;;  %1839 = vst [vmem:[#allocation7_spill] sm:$0xff] %v1244_v43 }
  0x28   :  { %v672_v52 = vadd.f32 %v671_v34, %v579_v24  ;;  %v321_v8 = vsel %vm320_vm2, %v1060_v16, %v319_v15  ;;  %v349_v57 = vsel %vm348_vm4, %v1075_v33, %v347_v56  ;;  %v375_v19 = vmul.f32 %v771_v60, %v1090_v55  ;;  %1836 = vst [vmem:[#allocation4_spill] sm:$0xff] %v1226_v47  ;;  %v1239_v24 = vld [vmem:[%s1797_s0 + $0x70] sm:$0xff] }
  0x29   :  { %v1213_v41 = vsel %vm294_vm1, %v295_v48, %v293_v58  ;;  %v379_v42 = vand.u32 2147483648, %v1090_v55  ;;  %vm452_vm8 = vcmp.eq.f32.partialorder %v1186_v7, inf  ;;  %vm454_vm9 = vcmp.eq.f32.partialorder %v1186_v7, 0.0  ;;  %v1234_v48 = vld [vmem:[%s1797_s0 + $0x50] sm:$0xff]  ;;  %1838 = vst [vmem:[#allocation6_spill] sm:$0xff] %v1239_v24 }
  0x2a   :  { %v673_v27 = vadd.f32 %v672_v52, %v583_v26  ;;  %v455_v12 = vand.u32 2147483648, %v1186_v7  ;;  %776 = vrsqrt.f32 %v1199_v61  ;;  %1837 = vst [vmem:[#allocation5_spill] sm:$0xff] %v1234_v48  ;;  %v1248_v53 = vsel %vm322_vm3, %v323_v13, %v321_v8  ;;  %v1259_v26 = vld [vmem:[%s1798_s1 + $0x30] sm:$0xff] }
  0x2b   :  { %v1252_v14 = vsel %vm350_vm5, %v351_v63, %v349_v57  ;;  %vm480_vm10 = vcmp.eq.f32.partialorder %v1189_v25, inf  ;;  %778 = vrsqrt.f32 %v1203_v6  ;;  %1840 = vst [vmem:[#allocation8_spill] sm:$0xff] %v1259_v26  ;;  %v1264_v34 = vld [vmem:[%s1798_s1 + $0x50] sm:$0xff]  ;;  %v377_v33 = vsel %vm376_vm6, %v1090_v55, %v375_v19 }
  0x2c   :  { %1841 = vst [vmem:[#allocation9_spill] sm:$0xff] %v1264_v34  ;;  %v1269_v16 = vld [vmem:[%s1798_s1 + $0x70] sm:$0xff]  ;;  %687 = vst [vmem:[%s1801_s4] sm:$0xff] %v673_v27  ;;  %vm482_vm11 = vcmp.eq.f32.partialorder %v1189_v25, 0.0  ;;  %v483_v13 = vand.u32 2147483648, %v1189_v25  ;;  %v237_v49 = vmul.f32 %v1221_v38, %v1221_v38  ;;  %v241_v15 = vmul.f32 %v1226_v47, %v1226_v47 }
  0x2d   :  { %1842 = vst [vmem:[#allocation10_spill] sm:$0xff] %v1269_v16  ;;  %v245_v52 = vmul.f32 %v1234_v48, %v1234_v48  ;;  %v249_v58 = vmul.f32 %v1239_v24, %v1239_v24  ;;  %v253_v56 = vmul.f32 %v1244_v43, %v1244_v43  ;;  %vm508_vm12 = vcmp.eq.f32.partialorder %v1199_v61, inf  ;;  %v1314_v55 = vld [vmem:[%s1799_s2 + $0x30] sm:$0xff] }
  0x2e   :  { %v257_v60 = vmul.f32 %v1259_v26, %v1259_v26  ;;  %v261_v63 = vmul.f32 %v1264_v34, %v1264_v34  ;;  %v265_v27 = vmul.f32 %v1269_v16, %v1269_v16  ;;  %v1298_v57 = vsel %vm378_vm7, %v379_v42, %v377_v33  ;;  %1844 = vst [vmem:[#allocation12_spill] sm:$0xff] %v1314_v55  ;;  %v1319_v42 = vld [vmem:[%s1799_s2 + $0x50] sm:$0xff] }
  0x2f   :  { %vm510_vm13 = vcmp.eq.f32.partialorder %v1199_v61, 0.0  ;;  %v511_v19 = vand.u32 2147483648, %v1199_v61  ;;  %v1307_v26 = vadd.f32 %v253_v56, %v237_v49  ;;  %vm536_vm14 = vcmp.eq.f32.partialorder %v1203_v6, inf  ;;  %1845 = vst [vmem:[#allocation13_spill] sm:$0xff] %v1319_v42 }
  0x30   :  { %v773_v8 = vpop.eup %772  ;;  %v1321_v33 = vadd.f32 %v257_v60, %v241_v15  ;;  %v1323_v16 = vadd.f32 %v261_v63, %v245_v52  ;;  %vm538_vm15 = vcmp.eq.f32.partialorder %v1203_v6, 0.0  ;;  %v539_v56 = vand.u32 2147483648, %v1203_v6 }
  0x31   :  { %v451_v34 = vmul.f32 %v773_v8, %v1186_v7  ;;  %v775_v49 = vpop.eup %774  ;;  %v1330_v8 = vld [vmem:[%s1799_s2 + $0x70] sm:$0xff]  ;;  %v1332_v43 = vadd.f32 %v265_v27, %v249_v58  ;;  %780 = vrsqrt.f32 %v1307_v26  ;;  %v397_v60 = vmul.f32 %v1305_v17, %v1305_v17 }
  0x32   :  { %1846 = vst [vmem:[#allocation14_spill] sm:$0xff] %v1330_v8  ;;  %v479_v52 = vmul.f32 %v775_v49, %v1189_v25  ;;  %782 = vrsqrt.f32 %v1321_v33  ;;  %v401_v58 = vmul.f32 %v1314_v55, %v1314_v55  ;;  %v405_v27 = vmul.f32 %v1319_v42, %v1319_v42 }
  0x33   :  { %v453_v15 = vsel %vm452_vm8, %v1186_v7, %v451_v34  ;;  %784 = vrsqrt.f32 %v1323_v16  ;;  %v1356_v7 = vld [vmem:[%s1800_s3 + $0x10] sm:$0xff]  ;;  %vm299_vm0 = vcmp.eq.f32.partialorder %v1307_v26, inf  ;;  %vm327_vm1 = vcmp.eq.f32.partialorder %v1321_v33, inf }
  0x34   :  { %v456_v63 = vsel %vm454_vm9, %v455_v12, %v453_v15  ;;  %v777_v24 = vpop.eup %776  ;;  %v481_v34 = vsel %vm480_vm10, %v1189_v25, %v479_v52  ;;  %1847 = vst [vmem:[#allocation15_spill] sm:$0xff] %v1356_v7  ;;  %v409_v12 = vmul.f32 %v1330_v8, %v1330_v8  ;;  %v302_v52 = vand.u32 2147483648, %v1307_v26  ;;  %v1376_v25 = vld [vmem:[%s1800_s3 + $0x50] sm:$0xff] }
  0x35   :  { %v556_v49 = vsub.f32 %v1213_v41, %v456_v63  ;;  %v779_v15 = vpop.eup %778  ;;  %v484_v48 = vsel %vm482_vm11, %v483_v13, %v481_v34  ;;  %v507_v42 = vmul.f32 %v777_v24, %v1199_v61  ;;  %v1367_v41 = vld [vmem:[%s1800_s3 + $0x30] sm:$0xff]  ;;  %786 = vrsqrt.f32 %v1332_v43  ;;  %1849 = vst [vmem:[#allocation17_spill] sm:$0xff] %v1376_v25 }
  0x36   :  { %1848 = vst [vmem:[#allocation16_spill] sm:$0xff] %v1367_v41  ;;  %v535_v63 = vmul.f32 %v779_v15, %v1203_v6  ;;  %v560_v47 = vsub.f32 %v1248_v53, %v484_v48  ;;  %v1381_v24 = vld [vmem:[%s1800_s3 + $0x70] sm:$0xff]  ;;  %vm301_vm2 = vcmp.eq.f32.partialorder %v1307_v26, 0.0  ;;  %vm329_vm3 = vcmp.eq.f32.partialorder %v1321_v33, 0.0 }
  0x37   :  { %v572_v8 = vand.u32 2147483647, %v556_v49  ;;  %1850 = vst [vmem:[#allocation18_spill] sm:$0xff] %v1381_v24  ;;  %v509_v13 = vsel %vm508_vm12, %v1199_v61, %v507_v42  ;;  %v330_v48 = vand.u32 2147483648, %v1321_v33  ;;  %v413_v53 = vmul.f32 %v1356_v7, %v1356_v7 }
  0x38   :  { %v512_v34 = vsel %vm510_vm13, %v511_v19, %v509_v13  ;;  %v537_v49 = vsel %vm536_vm14, %v1203_v6, %v535_v63  ;;  %v576_v15 = vand.u32 2147483647, %v560_v47  ;;  %v417_v42 = vmul.f32 %v1367_v41, %v1367_v41 }
  0x39   :  { %v540_v55 = vsel %vm538_vm15, %v539_v56, %v537_v49  ;;  %v564_v38 = vsub.f32 %v1252_v14, %v512_v34  ;;  %v421_v17 = vmul.f32 %v1376_v25, %v1376_v25  ;;  %v425_v61 = vmul.f32 %v1381_v24, %v1381_v24 }
  0x3a   :  { %v568_v19 = vsub.f32 %v1298_v57, %v540_v55  ;;  %v674_v13 = vadd.f32 %v576_v15, %v572_v8  ;;  %v1407_v7 = vadd.f32 %v413_v53, %v397_v60  ;;  %v1409_v47 = vadd.f32 %v417_v42, %v401_v58  ;;  %v1420_v57 = vld [vmem:[%s1797_s0 + $0x18] sm:$0xff] }
  0x3b   :  { %v781_v63 = vpop.eup %780  ;;  %v580_v41 = vand.u32 2147483647, %v564_v38  ;;  %vm355_vm4 = vcmp.eq.f32.partialorder %v1323_v16, inf  ;;  %vm357_vm5 = vcmp.eq.f32.partialorder %v1323_v16, 0.0  ;;  %v358_v6 = vand.u32 2147483648, %v1323_v16  ;;  %1851 = vst [vmem:[#allocation19_spill] sm:$0xff] %v1420_v57 }
  0x3c   :  { %v783_v14 = vpop.eup %782  ;;  %v584_v56 = vand.u32 2147483647, %v568_v19  ;;  %v298_v34 = vmul.f32 %v781_v63, %v1307_v26  ;;  %vm383_vm6 = vcmp.eq.f32.partialorder %v1332_v43, inf  ;;  %788 = vrsqrt.f32 %v1407_v7  ;;  %v1456_v63 = vld [vmem:[%s1797_s0 + $0x58] sm:$0xff] }
  0x3d   :  { %v785_v38 = vpop.eup %784  ;;  %v675_v55 = vadd.f32 %v674_v13, %v580_v41  ;;  %v326_v8 = vmul.f32 %v783_v14, %v1321_v33  ;;  %vm385_vm7 = vcmp.eq.f32.partialorder %v1332_v43, 0.0  ;;  %v1424_v60 = vadd.f32 %v421_v17, %v405_v27  ;;  %1853 = vst [vmem:[#allocation21_spill] sm:$0xff] %v1456_v63  ;;  %v1461_v14 = vld [vmem:[%s1797_s0 + $0x78] sm:$0xff] }
  0x3e   :  { %v354_v58 = vmul.f32 %v785_v38, %v1323_v16  ;;  %v386_v53 = vand.u32 2147483648, %v1332_v43  ;;  %v1428_v49 = vadd.f32 %v425_v61, %v409_v12  ;;  %790 = vrsqrt.f32 %v1409_v47  ;;  %v1448_v61 = vld [vmem:[%s1797_s0 + $0x38] sm:$0xff]  ;;  %1854 = vst [vmem:[#allocation22_spill] sm:$0xff] %v1461_v14 }
  0x3f   :  { %v787_v15 = vpop.eup %786  ;;  %v676_v42 = vadd.f32 %v675_v55, %v584_v56  ;;  %v300_v41 = vsel %vm299_vm0, %v1307_v26, %v298_v34  ;;  %v328_v19 = vsel %vm327_vm1, %v1321_v33, %v326_v8  ;;  %v238_v17 = vmul.f32 %v1420_v57, %v1420_v57  ;;  %1852 = vst [vmem:[#allocation20_spill] sm:$0xff] %v1448_v61  ;;  %v1466_v56 = vld [vmem:[%s1798_s1 + $0x18] sm:$0xff] }
  0x40   :  { %v356_v27 = vsel %vm355_vm4, %v1323_v16, %v354_v58  ;;  %v382_v12 = vmul.f32 %v787_v15, %v1332_v43  ;;  %vm459_vm8 = vcmp.eq.f32.partialorder %v1407_v7, inf  ;;  %vm461_vm9 = vcmp.eq.f32.partialorder %v1407_v7, 0.0  ;;  %1855 = vst [vmem:[#allocation23_spill] sm:$0xff] %v1466_v56  ;;  %v1479_v55 = vld [vmem:[%s1798_s1 + $0x38] sm:$0xff] }
  0x41   :  { %v462_v13 = vand.u32 2147483648, %v1407_v7  ;;  %vm487_vm10 = vcmp.eq.f32.partialorder %v1409_v47, inf  ;;  %792 = vrsqrt.f32 %v1424_v60  ;;  %v303_v34 = vsel %vm301_vm2, %v302_v52, %v300_v41  ;;  %1856 = vst [vmem:[#allocation24_spill] sm:$0xff] %v1479_v55  ;;  %v1484_v8 = vld [vmem:[%s1798_s1 + $0x58] sm:$0xff]  ;;  %688 = vst [vmem:[%s1801_s4 + $0x8] sm:$0xff] %v676_v42 }
  0x42   :  { %v1472_v38 = vsel %vm329_vm3, %v330_v48, %v328_v19  ;;  %vm489_vm11 = vcmp.eq.f32.partialorder %v1409_v47, 0.0  ;;  %794 = vrsqrt.f32 %v1428_v49  ;;  %1857 = vst [vmem:[#allocation25_spill] sm:$0xff] %v1484_v8  ;;  %v1489_v26 = vld [vmem:[%s1798_s1 + $0x78] sm:$0xff]  ;;  %v1496_v33 = vsel %vm357_vm5, %v358_v6, %v356_v27 }
  0x43   :  { %1858 = vst [vmem:[#allocation26_spill] sm:$0xff] %v1489_v26  ;;  %v384_v52 = vsel %vm383_vm6, %v1332_v43, %v382_v12  ;;  %v490_v48 = vand.u32 2147483648, %v1409_v47  ;;  %vm515_vm12 = vcmp.eq.f32.partialorder %v1424_v60, inf  ;;  %vm517_vm13 = vcmp.eq.f32.partialorder %v1424_v60, 0.0  ;;  %v1516_v41 = vld [vmem:[%s1799_s2 + $0x18] sm:$0xff] }
  0x44   :  { %v242_v58 = vmul.f32 %v1448_v61, %v1448_v61  ;;  %v246_v15 = vmul.f32 %v1456_v63, %v1456_v63  ;;  %v250_v16 = vmul.f32 %v1461_v14, %v1461_v14  ;;  %v254_v6 = vmul.f32 %v1466_v56, %v1466_v56  ;;  %1859 = vst [vmem:[#allocation27_spill] sm:$0xff] %v1516_v41  ;;  %v1521_v19 = vld [vmem:[%s1799_s2 + $0x38] sm:$0xff] }
  0x45   :  { %v518_v42 = vand.u32 2147483648, %v1424_v60  ;;  %1860 = vst [vmem:[#allocation28_spill] sm:$0xff] %v1521_v19  ;;  %v258_v27 = vmul.f32 %v1479_v55, %v1479_v55  ;;  %v262_v12 = vmul.f32 %v1484_v8, %v1484_v8  ;;  %v266_v56 = vmul.f32 %v1489_v26, %v1489_v26  ;;  %v1538_v61 = vld [vmem:[%s1799_s2 + $0x58] sm:$0xff] }
  0x46   :  { %v789_v14 = vpop.eup %788  ;;  %v1531_v63 = vsel %vm385_vm7, %v386_v53, %v384_v52  ;;  %vm543_vm14 = vcmp.eq.f32.partialorder %v1428_v49, inf  ;;  %vm545_vm15 = vcmp.eq.f32.partialorder %v1428_v49, 0.0  ;;  %1861 = vst [vmem:[#allocation29_spill] sm:$0xff] %v1538_v61  ;;  %v1540_v55 = vadd.f32 %v254_v6, %v238_v17  ;;  %v1546_v26 = vld [vmem:[%s1799_s2 + $0x78] sm:$0xff] }
  0x47   :  { %v458_v8 = vmul.f32 %v789_v14, %v1407_v7  ;;  %1862 = vst [vmem:[#allocation30_spill] sm:$0xff] %v1546_v26  ;;  %v1548_v43 = vadd.f32 %v258_v27, %v242_v58  ;;  %v1550_v53 = vadd.f32 %v262_v12, %v246_v15  ;;  %v1552_v52 = vadd.f32 %v266_v56, %v250_v16  ;;  %v1579_v12 = vld [vmem:[%s1800_s3 + $0x18] sm:$0xff] }
  0x48   :  { %v791_v57 = vpop.eup %790  ;;  %v546_v24 = vand.u32 2147483648, %v1428_v49  ;;  %796 = vrsqrt.f32 %v1540_v55  ;;  %v398_v17 = vmul.f32 %v1516_v41, %v1516_v41  ;;  %v402_v14 = vmul.f32 %v1521_v19, %v1521_v19  ;;  %1863 = vst [vmem:[#allocation31_spill] sm:$0xff] %v1579_v12 }
  0x49   :  { %v460_v58 = vsel %vm459_vm8, %v1407_v7, %v458_v8  ;;  %v486_v15 = vmul.f32 %v791_v57, %v1409_v47  ;;  %798 = vrsqrt.f32 %v1548_v43  ;;  %v406_v56 = vmul.f32 %v1538_v61, %v1538_v61 }
  0x4a   :  { %v463_v16 = vsel %vm461_vm9, %v462_v13, %v460_v58  ;;  %vm306_vm0 = vcmp.eq.f32.partialorder %v1540_v55, inf  ;;  %800 = vrsqrt.f32 %v1550_v53  ;;  %v410_v6 = vmul.f32 %v1546_v26, %v1546_v26 }
  0x4b   :  { %v793_v27 = vpop.eup %792  ;;  %v488_v57 = vsel %vm487_vm10, %v1409_v47, %v486_v15  ;;  %v557_v8 = vsub.f32 %v303_v34, %v463_v16  ;;  %v309_v7 = vand.u32 2147483648, %v1540_v55  ;;  %vm334_vm1 = vcmp.eq.f32.partialorder %v1548_v43, inf  ;;  %v1589_v15 = vld [vmem:[%s1800_s3 + $0x38] sm:$0xff] }
  0x4c   :  { %v795_v13 = vpop.eup %794  ;;  %v491_v58 = vsel %vm489_vm11, %v490_v48, %v488_v57  ;;  %v514_v26 = vmul.f32 %v793_v27, %v1424_v60  ;;  %1864 = vst [vmem:[#allocation32_spill] sm:$0xff] %v1589_v15  ;;  %vm308_vm2 = vcmp.eq.f32.partialorder %v1540_v55, 0.0  ;;  %v337_v34 = vand.u32 2147483648, %v1548_v43  ;;  %v1599_v47 = vld [vmem:[%s1800_s3 + $0x58] sm:$0xff] }
  0x4d   :  { %802 = vrsqrt.f32 %v1552_v52  ;;  %v542_v16 = vmul.f32 %v795_v13, %v1428_v49  ;;  %v561_v61 = vsub.f32 %v1472_v38, %v491_v58  ;;  %v573_v19 = vand.u32 2147483647, %v557_v8  ;;  %v1604_v48 = vld [vmem:[%s1800_s3 + $0x78] sm:$0xff] }
  0x4e   :  { %vm336_vm3 = vcmp.eq.f32.partialorder %v1548_v43, 0.0  ;;  %vm362_vm4 = vcmp.eq.f32.partialorder %v1550_v53, inf  ;;  %v516_v27 = vsel %vm515_vm12, %v1424_v60, %v514_v26  ;;  %vm364_vm5 = vcmp.eq.f32.partialorder %v1550_v53, 0.0 }
  0x4f   :  { %v365_v38 = vand.u32 2147483648, %v1550_v53  ;;  %v414_v57 = vmul.f32 %v1579_v12, %v1579_v12  ;;  %v519_v8 = vsel %vm517_vm13, %v518_v42, %v516_v27  ;;  %v544_v13 = vsel %vm543_vm14, %v1428_v49, %v542_v16 }
  0x50   :  { %v577_v58 = vand.u32 2147483647, %v561_v61  ;;  %v418_v41 = vmul.f32 %v1589_v15, %v1589_v15  ;;  %v547_v26 = vsel %vm545_vm15, %v546_v24, %v544_v13  ;;  %v565_v25 = vsub.f32 %v1496_v33, %v519_v8 }
  0x51   :  { %v422_v54 = vmul.f32 %v1599_v47, %v1599_v47  ;;  %v426_v60 = vmul.f32 %v1604_v48, %v1604_v48  ;;  %v569_v42 = vsub.f32 %v1531_v63, %v547_v26  ;;  %v1630_v12 = vadd.f32 %v414_v57, %v398_v17 }
  0x52   :  { %v677_v27 = vadd.f32 %v577_v58, %v573_v19  ;;  %v1632_v61 = vadd.f32 %v418_v41, %v402_v14  ;;  %v797_v16 = vpop.eup %796  ;;  %v581_v15 = vand.u32 2147483647, %v565_v25  ;;  %vm390_vm6 = vcmp.eq.f32.partialorder %v1552_v52, inf }
  0x53   :  { %v1635_v24 = vadd.f32 %v422_v54, %v406_v56  ;;  %v1637_v49 = vadd.f32 %v426_v60, %v410_v6  ;;  %v799_v33 = vpop.eup %798  ;;  %v585_v8 = vand.u32 2147483647, %v569_v42  ;;  %v305_v13 = vmul.f32 %v797_v16, %v1540_v55 }
  0x54   :  { %vm392_vm7 = vcmp.eq.f32.partialorder %v1552_v52, 0.0  ;;  %804 = vrsqrt.f32 %v1630_v12  ;;  %v801_v63 = vpop.eup %800  ;;  %v678_v19 = vadd.f32 %v677_v27, %v581_v15  ;;  %v333_v41 = vmul.f32 %v799_v33, %v1548_v43 }
  0x55   :  { %v393_v25 = vand.u32 2147483648, %v1552_v52  ;;  %v591_v54 = vsub.f32 %v850_v1, %v917_v21  ;;  %v307_v17 = vsel %vm306_vm0, %v1540_v55, %v305_v13  ;;  %v361_v14 = vmul.f32 %v801_v63, %v1550_v53 }
  0x56   :  { %vm466_vm8 = vcmp.eq.f32.partialorder %v1630_v12, inf  ;;  %806 = vrsqrt.f32 %v1632_v61  ;;  %v679_v6 = vadd.f32 %v678_v19, %v585_v8  ;;  %v335_v15 = vsel %vm334_vm1, %v1548_v43, %v333_v41 }
  0x57   :  { %v803_v56 = vpop.eup %802  ;;  %vm468_vm9 = vcmp.eq.f32.partialorder %v1630_v12, 0.0  ;;  %v469_v1 = vand.u32 2147483648, %v1630_v12  ;;  %v310_v21 = vsel %vm308_vm2, %v309_v7, %v307_v17  ;;  %v363_v57 = vsel %vm362_vm4, %v1550_v53, %v361_v14 }
  0x58   :  { %v389_v58 = vmul.f32 %v803_v56, %v1552_v52  ;;  %vm494_vm10 = vcmp.eq.f32.partialorder %v1632_v61, inf  ;;  %v1666_v26 = vsel %vm336_vm3, %v337_v34, %v335_v15  ;;  %vm496_vm11 = vcmp.eq.f32.partialorder %v1632_v61, 0.0  ;;  %689 = vst [vmem:[%s1801_s4 + $0x10] sm:$0xff] %v679_v6 }
  0x59   :  { %808 = vrsqrt.f32 %v1635_v24  ;;  %v1672_v55 = vsel %vm364_vm5, %v365_v38, %v363_v57  ;;  %v497_v60 = vand.u32 2147483648, %v1632_v61  ;;  %vm522_vm12 = vcmp.eq.f32.partialorder %v1635_v24, inf }
  0x5a   :  { %v391_v7 = vsel %vm390_vm6, %v1552_v52, %v389_v58  ;;  %810 = vrsqrt.f32 %v1637_v49  ;;  %v525_v53 = vand.u32 2147483648, %v1635_v24  ;;  %v553_v34 = vand.u32 2147483648, %v1637_v49 }
  0x5b   :  { %v1684_v43 = vsel %vm392_vm7, %v393_v25, %v391_v7  ;;  %vm524_vm13 = vcmp.eq.f32.partialorder %v1635_v24, 0.0  ;;  %vm550_vm14 = vcmp.eq.f32.partialorder %v1637_v49, inf  ;;  %v595_v38 = vsub.f32 %v855_v2, %v922_v22 }
  0x5c   :  { %v599_v42 = vsub.f32 %v860_v3, %v927_v23  ;;  %v1865_v52 = vsub.f32 %v845_v0, %v891_v11  ;;  %v607_v16 = vand.u32 2147483647, %v591_v54  ;;  %vm552_vm15 = vcmp.eq.f32.partialorder %v1637_v49, 0.0 }
  0x5d   :  { %v619_v33 = vsub.f32 %v865_v4, %v908_v18  ;;  %v623_v8 = vsub.f32 %v870_v5, %v941_v28  ;;  %v627_v13 = vsub.f32 %v881_v9, %v946_v29  ;;  %v631_v2 = vsub.f32 %v886_v10, %v951_v30 }
  0x5e   :  { %v603_v27 = vand.u32 2147483647, %v1865_v52  ;;  %v805_v3 = vpop.eup %804  ;;  %v611_v22 = vand.u32 2147483647, %v595_v38  ;;  %v615_v23 = vand.u32 2147483647, %v599_v42  ;;  %v588_v0 = vsub.f32 %v976_v39, %v1068_v31 }
  0x5f   :  { %v592_v11 = vsub.f32 %v993_v44, %v1073_v32  ;;  %v465_v4 = vmul.f32 %v805_v3, %v1630_v12  ;;  %v635_v18 = vand.u32 2147483647, %v619_v33  ;;  %v639_v63 = vand.u32 2147483647, %v623_v8  ;;  %v1866_v38 = vld [vmem:[#allocation2_spill] sm:$0xff] }
  0x60   :  { %v643_v5 = vand.u32 2147483647, %v627_v13  ;;  %v807_v28 = vpop.eup %806  ;;  %v647_v19 = vand.u32 2147483647, %v631_v2  ;;  %v596_v9 = vsub.f32 %v998_v45, %v1117_v20  ;;  %v600_v10 = vsub.f32 %v1003_v46, %v1136_v37 }
  0x61   :  { %v604_v29 = vand.u32 2147483647, %v588_v0  ;;  %v467_v30 = vsel %vm466_vm8, %v1630_v12, %v465_v4  ;;  %v493_v39 = vmul.f32 %v807_v28, %v1632_v61  ;;  %v651_v44 = vadd.f32 %v635_v18, %v603_v27  ;;  %v1871_v4 = vld [vmem:[#allocation13_spill] sm:$0xff]  ;;  %v1874_v28 = vld [vmem:[#allocation6_spill] sm:$0xff] }
  0x62   :  { %v655_v31 = vadd.f32 %v639_v63, %v607_v16  ;;  %v470_v32 = vsel %vm468_vm9, %v469_v1, %v467_v30  ;;  %v659_v41 = vadd.f32 %v643_v5, %v611_v22  ;;  %v663_v25 = vadd.f32 %v647_v19, %v615_v23  ;;  %v1870_v22 = vld [vmem:[#allocation4_spill] sm:$0xff]  ;;  %v1872_v18 = vld [vmem:[#allocation5_spill] sm:$0xff]  ;;  %v1873_v5 = vld [vmem:[#allocation14_spill] sm:$0xff] }
  0x63   :  { %v608_v54 = vand.u32 2147483647, %v592_v11  ;;  %v809_v17 = vpop.eup %808  ;;  %v495_v45 = vsel %vm494_vm10, %v1632_v61, %v493_v39  ;;  %v558_v46 = vsub.f32 %v310_v21, %v470_v32  ;;  %v612_v37 = vand.u32 2147483647, %v596_v9  ;;  %v1876_v30 = vld [vmem:[#allocation7_spill] sm:$0xff] }
  0x64   :  { %v695_v20 = vadd.f32 %v655_v31, %v651_v44  ;;  %v811_v14 = vpop.eup %810  ;;  %v498_v56 = vsel %vm496_vm11, %v497_v60, %v495_v45  ;;  %v521_v6 = vmul.f32 %v809_v17, %v1635_v24  ;;  %v616_v15 = vand.u32 2147483647, %v600_v10  ;;  %v1879_v45 = vld [vmem:[#allocation17_spill] sm:$0xff] }
  0x65   :  { %v620_v12 = vsub.f32 %v981_v40, %v1141_v59  ;;  %v549_v1 = vmul.f32 %v811_v14, %v1637_v49  ;;  %v562_v57 = vsub.f32 %v1666_v26, %v498_v56  ;;  %v574_v58 = vand.u32 2147483647, %v558_v46  ;;  %v1880_v46 = vld [vmem:[#allocation9_spill] sm:$0xff]  ;;  %v1882_v14 = vld [vmem:[#allocation10_spill] sm:$0xff] }
  0x66   :  { %v696_v7 = vadd.f32 %v695_v20, %v659_v41  ;;  %v523_v21 = vsel %vm522_vm12, %v1635_v24, %v521_v6  ;;  %v624_v61 = vsub.f32 %v1017_v50, %v1152_v35  ;;  %v628_v60 = vsub.f32 %v1022_v51, %v1157_v36  ;;  %v1877_v41 = vld [vmem:[#allocation16_spill] sm:$0xff] }
  0x67   :  { %v632_v42 = vsub.f32 %v1866_v38, %v1170_v62  ;;  %v526_v40 = vsel %vm524_vm13, %v525_v53, %v523_v21  ;;  %v551_v59 = vsel %vm550_vm14, %v1637_v49, %v549_v1  ;;  %v578_v26 = vand.u32 2147483647, %v562_v57  ;;  %v1867_v49 = vld [vmem:[#allocation11_spill] sm:$0xff]  ;;  %v1886_v38 = vld [vmem:[#allocation20_spill] sm:$0xff] }
  0x68   :  { %v697_v52 = vadd.f32 %v696_v7, %v663_v25  ;;  %v554_v27 = vsel %vm552_vm15, %v553_v34, %v551_v59  ;;  %v566_v50 = vsub.f32 %v1672_v55, %v526_v40  ;;  %v636_v35 = vand.u32 2147483647, %v620_v12  ;;  %v1868_v34 = vld [vmem:[#allocation3_spill] sm:$0xff]  ;;  %v1869_v55 = vld [vmem:[#allocation12_spill] sm:$0xff]  ;;  %v1887_v59 = vld [vmem:[#allocation29_spill] sm:$0xff] }
  0x69   :  { %v640_v16 = vand.u32 2147483647, %v624_v61  ;;  %v570_v51 = vsub.f32 %v1684_v43, %v554_v27  ;;  %v680_v36 = vadd.f32 %v578_v26, %v574_v58  ;;  %v644_v62 = vand.u32 2147483647, %v628_v60  ;;  %v1878_v25 = vld [vmem:[#allocation8_spill] sm:$0xff]  ;;  %v1883_v1 = vld [vmem:[#allocation27_spill] sm:$0xff] }
  0x6a   :  { %v582_v33 = vand.u32 2147483647, %v566_v50  ;;  %v648_v24 = vand.u32 2147483647, %v632_v42  ;;  %v652_v53 = vadd.f32 %v636_v35, %v604_v29  ;;  %711 = vst [vmem:[%s1802_s5] sm:$0xff] %v697_v52  ;;  %v589_v3 = vsub.f32 %v1868_v34, %v1867_v49  ;;  %v1875_v29 = vld [vmem:[#allocation15_spill] sm:$0xff]  ;;  %v1885_v60 = vld [vmem:[#allocation28_spill] sm:$0xff] }
  0x6b   :  { %v656_v8 = vadd.f32 %v640_v16, %v608_v54  ;;  %v586_v13 = vand.u32 2147483647, %v570_v51  ;;  %v660_v2 = vadd.f32 %v644_v62, %v612_v37  ;;  %v593_v23 = vsub.f32 %v1870_v22, %v1869_v55  ;;  %v1881_v37 = vld [vmem:[#allocation18_spill] sm:$0xff]  ;;  %v1884_v57 = vld [vmem:[#allocation19_spill] sm:$0xff]  ;;  %v1888_v26 = vld [vmem:[#allocation21_spill] sm:$0xff] }
  0x6c   :  { %v681_v0 = vadd.f32 %v680_v36, %v582_v33  ;;  %v664_v43 = vadd.f32 %v648_v24, %v616_v15  ;;  %v597_v63 = vsub.f32 %v1872_v18, %v1871_v4  ;;  %v601_v19 = vsub.f32 %v1874_v28, %v1873_v5  ;;  %v1889_v27 = vld [vmem:[#allocation30_spill] sm:$0xff]  ;;  %v1893_v49 = vld [vmem:[#allocation32_spill] sm:$0xff]  ;;  %v1895_v55 = vld [vmem:[#allocation25_spill] sm:$0xff] }
  0x6d   :  { %v698_v11 = vadd.f32 %v656_v8, %v652_v53  ;;  %v605_v9 = vand.u32 2147483647, %v589_v3  ;;  %v609_v10 = vand.u32 2147483647, %v593_v23  ;;  %v621_v39 = vsub.f32 %v1876_v30, %v1875_v29  ;;  %v1890_v50 = vld [vmem:[#allocation22_spill] sm:$0xff]  ;;  %v1891_v53 = vld [vmem:[#allocation31_spill] sm:$0xff] }
  0x6e   :  { %v682_v44 = vadd.f32 %v681_v0, %v586_v13  ;;  %v613_v32 = vand.u32 2147483647, %v597_v63  ;;  %v625_v54 = vsub.f32 %v1878_v25, %v1877_v41  ;;  %v617_v17 = vand.u32 2147483647, %v601_v19  ;;  %v1892_v8 = vld [vmem:[#allocation23_spill] sm:$0xff]  ;;  %v1894_v34 = vld [vmem:[#allocation24_spill] sm:$0xff] }
  0x6f   :  { %v699_v31 = vadd.f32 %v698_v11, %v660_v2  ;;  %v629_v20 = vsub.f32 %v1880_v46, %v1879_v45  ;;  %v633_v56 = vsub.f32 %v1882_v14, %v1881_v37  ;;  %v637_v6 = vand.u32 2147483647, %v621_v39  ;;  %v1896_v23 = vld [vmem:[#allocation26_spill] sm:$0xff] }
  0x70   :  { %v641_v12 = vand.u32 2147483647, %v625_v54  ;;  %v590_v58 = vsub.f32 %v1884_v57, %v1883_v1  ;;  %v594_v42 = vsub.f32 %v1886_v38, %v1885_v60  ;;  %690 = vst [vmem:[%s1801_s4 + $0x18] sm:$0xff] %v682_v44  ;;  %v598_v52 = vsub.f32 %v1888_v26, %v1887_v59 }
  0x71   :  { %v700_v15 = vadd.f32 %v699_v31, %v664_v43  ;;  %v645_v7 = vand.u32 2147483647, %v629_v20  ;;  %v649_v21 = vand.u32 2147483647, %v633_v56  ;;  %v653_v61 = vadd.f32 %v637_v6, %v605_v9 }
  0x72   :  { %v657_v40 = vadd.f32 %v641_v12, %v609_v10  ;;  %v602_v35 = vsub.f32 %v1890_v50, %v1889_v27  ;;  %v606_v36 = vand.u32 2147483647, %v590_v58  ;;  %v610_v33 = vand.u32 2147483647, %v594_v42 }
  0x73   :  { %v661_v16 = vadd.f32 %v645_v7, %v613_v32  ;;  %v665_v51 = vadd.f32 %v649_v21, %v617_v17  ;;  %712 = vst [vmem:[%s1802_s5 + $0x8] sm:$0xff] %v700_v15  ;;  %v614_v24 = vand.u32 2147483647, %v598_v52  ;;  %v622_v13 = vsub.f32 %v1892_v8, %v1891_v53 }
  0x74   :  { %v701_v62 = vadd.f32 %v657_v40, %v653_v61  ;;  %v618_v2 = vand.u32 2147483647, %v602_v35  ;;  %v626_v3 = vsub.f32 %v1894_v34, %v1893_v49  ;;  %v630_v22 = vsub.f32 %v1895_v55, %v1599_v47 }
  0x75   :  { %v634_v0 = vsub.f32 %v1896_v23, %v1604_v48  ;;  %v638_v11 = vand.u32 2147483647, %v622_v13 }
  0x76   :  { %v702_v43 = vadd.f32 %v701_v62, %v661_v16  ;;  %v642_v4 = vand.u32 2147483647, %v626_v3  ;;  %v646_v18 = vand.u32 2147483647, %v630_v22 }
  0x77   :  { %v650_v63 = vand.u32 2147483647, %v634_v0  ;;  %v654_v28 = vadd.f32 %v638_v11, %v606_v36 }
  0x78   :  { %v703_v5 = vadd.f32 %v702_v43, %v665_v51  ;;  %v658_v19 = vadd.f32 %v642_v4, %v610_v33  ;;  %v662_v9 = vadd.f32 %v646_v18, %v614_v24 }
  0x79   :  { %v666_v10 = vadd.f32 %v650_v63, %v618_v2 }
  0x7a   :  { %v704_v29 = vadd.f32 %v658_v19, %v654_v28  ;;  %713 = vst [vmem:[%s1802_s5 + $0x10] sm:$0xff] %v703_v5 }
  0x7c   :  { %v705_v30 = vadd.f32 %v704_v29, %v662_v9 }
  0x7e   :  { %v706_v47 = vadd.f32 %v705_v30, %v666_v10 }
  0x80   :  { %714 = vst [vmem:[%s1802_s5 + $0x18] sm:$0xff] %v706_v47 }

</bundles_post_ra>
